<compile_context>
chip_gen: v6e
topology: v6e:2x2x1
jax: 0.10.0
libtpu: 0.0.40
codegen_flags: <defaults>
</compile_context>

<pallas_src>
import math

import jax
import jax.numpy as jnp
from jax import lax
from jax.experimental import pallas as pl
from jax.experimental.pallas import tpu as pltpu

_INV_SQRT2 = 1.0 / math.sqrt(2.0)


def _round_up(n: int, m: int) -> int:
    return ((n + m - 1) // m) * m


def _vmem_capacity_bytes() -> int:
    try:
        return int(pltpu.get_tpu_info().vmem_capacity_bytes)
    except Exception:
        return 64 << 20  # conservative (v7x-sized) fallback


def _gelu_exact_f32(h):
    # Exact (erf-based) GELU, matching torch.nn.GELU() default numerics.
    return 0.5 * h * (1.0 + lax.erf(h * jnp.float32(_INV_SQRT2)))


def _resident_spec(shape, index_map):
    """BlockSpec for a constant-index (grid-invariant) operand: single buffer."""
    try:
        return pl.BlockSpec(shape, index_map, pipeline_mode=pl.Buffered(1))
    except TypeError:  # older BlockSpec signature without pipeline_mode
        return pl.BlockSpec(shape, index_map)


def _pick_batch_tile(b8: int, tile_b: int) -> int:
    """b8 = batch rounded to 8. Prefer >=2 grid steps (megacore) and
    MXU-friendly tile heights for larger batches."""
    if b8 <= 8:
        return 8
    if b8 > 2 * tile_b:
        return tile_b
    half = -(-b8 // 2)
    tb = _round_up(half, 8)
    if tb >= 256:
        tb = _round_up(tb, 128)  # MXU-friendly for mid/large batches
    return min(tb, tile_b)


# ----------------------------------------------------------------------------
# Kernels
# ----------------------------------------------------------------------------
def _resblock_kernel_resident(x_ref, w1t_ref, b1_ref, w2t_ref, b2_ref, o_ref):
    """out = gelu(x @ W1^T + b1) @ W2^T + b2 + x, weights fully VMEM-resident.

    x_ref  : (TB, Dp) f32   w1t_ref: (Dp, Ip) bf16   b1_ref: (1, Ip) f32
    w2t_ref: (Ip, Dp) bf16  b2_ref : (1, Dp)  f32    o_ref : (TB, Dp) f32
    """
    # bf16 cast immediately; don't keep an f32 copy of x live across the body.
    xb = x_ref[...].astype(jnp.bfloat16)
    h = jnp.dot(xb, w1t_ref[...], preferred_element_type=jnp.float32) + b1_ref[...]
    g = _gelu_exact_f32(h)
    out = jnp.dot(g.astype(jnp.bfloat16), w2t_ref[...],
                  preferred_element_type=jnp.float32)
    # Re-read x fresh (cheap vld) for the exact f32 residual add.
    o_ref[...] = (out + b2_ref[...] + x_ref[...]).astype(o_ref.dtype)


def _resblock_kernel_streamed(x_ref, w1t_ref, b1_ref, w2t_ref, b2_ref, o_ref,
                              acc_ref):
    """Same math, streaming the `inter` axis in chunks of TK (exact split:
    GELU is elementwise over inter, so each chunk's fc2 partial product
    accumulates independently).

    x_ref: (TB, Dp) f32   w1t_ref: (Dp, TK) bf16   b1_ref: (1, TK) f32
    w2t_ref: (TK, Dp) bf16   b2_ref: (1, Dp) f32   acc_ref: (TB, Dp) f32 scratch
    """
    k = pl.program_id(1)

    @pl.when(k == 0)
    def _():
        acc_ref[...] = jnp.zeros_like(acc_ref)

    xb = x_ref[...].astype(jnp.bfloat16)
    h = jnp.dot(xb, w1t_ref[...], preferred_element_type=jnp.float32) + b1_ref[...]
    g = _gelu_exact_f32(h)
    acc_ref[...] += jnp.dot(g.astype(jnp.bfloat16), w2t_ref[...],
                            preferred_element_type=jnp.float32)

    @pl.when(k == pl.num_programs(1) - 1)
    def _():
        o_ref[...] = (acc_ref[...] + b2_ref[...] + x_ref[...]).astype(o_ref.dtype)


# ----------------------------------------------------------------------------
# Wrapper
# ----------------------------------------------------------------------------
def prepare_resblock_params(w1, b1, w2, b2):
    """Hoisted, call-once parameter prep: pad to lane-dense (multiples of 128),
    pre-transpose for (x @ W^T), and cast weights to bf16 for the MXU.
    PyTorch layout: w1 (inter, start_dim), b1 (inter,), w2 (start_dim, inter), b2 (start_dim,)."""
    inter, start_dim = w1.shape
    dp = _round_up(start_dim, 128)
    ip = _round_up(inter, 128)
    f32, bf16 = jnp.float32, jnp.bfloat16

    w1t = w1.T.astype(bf16)                    # (start_dim, inter)
    w2t = w2.T.astype(bf16)                    # (inter, start_dim)
    b1p = b1.astype(f32).reshape(1, inter)
    b2p = b2.astype(f32).reshape(1, start_dim)

    if (dp, ip) != (start_dim, inter):
        # Zero padding is exact: padded input cols / weight rows contribute 0,
        # gelu(0)=0 on padded hidden cols, padded output cols are sliced off.
        w1t = jnp.zeros((dp, ip), bf16).at[:start_dim, :inter].set(w1t)
        w2t = jnp.zeros((ip, dp), bf16).at[:inter, :start_dim].set(w2t)
        b1p = jnp.zeros((1, ip), f32).at[:, :inter].set(b1p)
        b2p = jnp.zeros((1, dp), f32).at[:, :start_dim].set(b2p)

    return {"w1t": w1t, "b1": b1p, "w2t": w2t, "b2": b2p}


def resblock_forward(x, params, *, tile_b=512):
    """x: (B, start_dim) -> (B, start_dim). `params` from prepare_resblock_params."""
    B, start_dim = x.shape
    w1t, b1p, w2t, b2p = params["w1t"], params["b1"], params["w2t"], params["b2"]
    dp, ip = w1t.shape

    vmem_cap = _vmem_capacity_bytes()
    vmem_budget = int(vmem_cap * 0.75)   # headroom for compiler scratch / spills

    # Single-buffered resident-weight footprint (bf16 weights + f32 biases).
    weights_bytes = 2 * (dp * ip + ip * dp) + 4 * (ip + dp)
    stream_inter = weights_bytes > min(40 << 20, vmem_cap // 2)

    if stream_inter:
        tk = 128
        for cand in (512, 384, 256):
            if ip % cand == 0:
                tk = cand
                break
        # double-buffered bf16 weight chunks + single-buffered biases
        w_resident_bytes = 2 * 2 * (dp * tk + tk * dp) + 4 * (ip + dp)
    else:
        tk = ip
        w_resident_bytes = weights_bytes

    def vmem_needed(tb):
        acc = tb * dp * 4 if stream_inter else 0
        return 2 * 2 * tb * dp * 4 + acc + w_resident_bytes   # 2x-buffered x/out

    b8 = _round_up(B, 8)
    tb = _pick_batch_tile(b8, tile_b)
    while tb > 8 and vmem_needed(tb) > vmem_budget:
        tb = max(8, _round_up(tb // 2, 8))

    bp = _round_up(b8, tb)
    vmem_limit = int(min(max(int(vmem_needed(tb) * 1.2), 16 << 20), vmem_budget))

    # Activation pad only when needed (skipped entirely for aligned shapes).
    xp = x.astype(jnp.float32)
    if (bp, dp) != (B, start_dim):
        xp = jnp.zeros((bp, dp), jnp.float32).at[:B, :start_dim].set(xp)

    cost = pl.CostEstimate(
        flops=4 * bp * dp * ip,                       # two GEMMs
        transcendentals=bp * ip,                      # erf per hidden element
        bytes_accessed=2 * bp * dp * 4 + 2 * dp * ip * 2 + (ip + dp) * 4,
    )

    if not stream_inter:
        grid = (bp // tb,)
        out_p = pl.pallas_call(
            _resblock_kernel_resident,
            out_shape=jax.ShapeDtypeStruct((bp, dp), jnp.float32),
            grid_spec=pltpu.PrefetchScalarGridSpec(
                num_scalar_prefetch=0,
                grid=grid,
                in_specs=[
                    pl.BlockSpec((tb, dp), lambda i: (i, 0)),        # x batch tile
                    _resident_spec((dp, ip), lambda i: (0, 0)),      # W1^T resident
                    _resident_spec((1, ip), lambda i: (0, 0)),       # b1
                    _resident_spec((ip, dp), lambda i: (0, 0)),      # W2^T resident
                    _resident_spec((1, dp), lambda i: (0, 0)),       # b2
                ],
                out_specs=pl.BlockSpec((tb, dp), lambda i: (i, 0)),
            ),
            compiler_params=pltpu.CompilerParams(
                dimension_semantics=("parallel",),
                vmem_limit_bytes=vmem_limit,
            ),
            cost_estimate=cost,
        )(xp, w1t, b1p, w2t, b2p)
    else:
        # Stream the inter axis (reduction-last grid, accumulator in scratch).
        grid = (bp // tb, ip // tk)
        out_p = pl.pallas_call(
            _resblock_kernel_streamed,
            out_shape=jax.ShapeDtypeStruct((bp, dp), jnp.float32),
            grid_spec=pltpu.PrefetchScalarGridSpec(
                num_scalar_prefetch=0,
                grid=grid,
                in_specs=[
                    pl.BlockSpec((tb, dp), lambda i, k: (i, 0)),     # x batch tile
                    pl.BlockSpec((dp, tk), lambda i, k: (0, k)),     # W1^T chunk
                    pl.BlockSpec((1, tk), lambda i, k: (0, k)),      # b1 chunk
                    pl.BlockSpec((tk, dp), lambda i, k: (k, 0)),     # W2^T chunk
                    _resident_spec((1, dp), lambda i, k: (0, 0)),    # b2
                ],
                out_specs=pl.BlockSpec((tb, dp), lambda i, k: (i, 0)),
                scratch_shapes=[pltpu.VMEM((tb, dp), jnp.float32)],
            ),
            compiler_params=pltpu.CompilerParams(
                dimension_semantics=("parallel", "arbitrary"),
                vmem_limit_bytes=vmem_limit,
            ),
            cost_estimate=cost,
        )(xp, w1t, b1p, w2t, b2p)

    out = out_p
    if (bp, dp) != (B, start_dim):
        out = out[:B, :start_dim]
    return out.astype(x.dtype)


def resblock_ref(x, w1, b1, w2, b2):
    """Pure-JAX f32 reference mirroring the PyTorch forward (erf GELU)."""
    h = x @ w1.T + b1
    g = 0.5 * h * (1.0 + lax.erf(h * (1.0 / math.sqrt(2.0))))
    return g @ w2.T + b2 + x


if __name__ == "__main__":
    # Small shapes consistent with the module: Linear(start_dim -> inter -> start_dim).
    batch, start_dim, inter = 16, 32, 64
    key = jax.random.PRNGKey(0)
    kx, kw1, kb1, kw2, kb2 = jax.random.split(key, 5)

    x = jax.random.normal(kx, (batch, start_dim), dtype=jnp.float32)

    # PyTorch Linear init ranges: uniform(-1/sqrt(in), 1/sqrt(in)).
    bound1 = 1.0 / math.sqrt(start_dim)
    w1 = jax.random.uniform(kw1, (inter, start_dim), jnp.float32, -bound1, bound1)
    b1 = jax.random.uniform(kb1, (inter,), jnp.float32, -bound1, bound1)
    bound2 = 1.0 / math.sqrt(inter)
    w2 = jax.random.uniform(kw2, (start_dim, inter), jnp.float32, -bound2, bound2)
    b2 = jax.random.uniform(kb2, (start_dim,), jnp.float32, -bound2, bound2)

    # Hoisted, one-time weight prep (reused across calls).
    params = jax.block_until_ready(prepare_resblock_params(w1, b1, w2, b2))

    fwd = jax.jit(resblock_forward)
    out = jax.block_until_ready(fwd(x, params))

    ref = resblock_ref(x, w1, b1, w2, b2)
    assert out.shape == (batch, start_dim)
    # bf16 MXU operands vs pure-f32 reference -> loosened tolerance.
    assert jnp.allclose(out, ref, atol=3e-2, rtol=3e-2), "mismatch vs reference"

    print("KERNEL_OK")
</pallas_src>

<mosaic_0001>
module attributes {stable_mosaic.version = 11 : i64} {
  func.func @_resblock_kernel_resident(%arg0: i32, %arg1: memref<8x128xf32, #tpu.memory_space<vmem>>, %arg2: memref<128x128xbf16, #tpu.memory_space<vmem>>, %arg3: memref<1x128xf32, #tpu.memory_space<vmem>>, %arg4: memref<128x128xbf16, #tpu.memory_space<vmem>>, %arg5: memref<1x128xf32, #tpu.memory_space<vmem>>, %arg6: memref<8x128xf32, #tpu.memory_space<vmem>>) attributes {dimension_semantics = [#tpu.dimension_semantics<parallel>], iteration_bounds = array<i64: 2>, scalar_prefetch = 0 : i64, scratch_operands = 0 : i64, tpu.core_type = #tpu.core_type<tc>, window_params = [{transform_indices = @transform_0, window_bounds = array<i64: 8, 128>}, {pipeline_mode = #tpu.pipeline_mode<synchronous>, transform_indices = @transform_1, window_bounds = array<i64: 128, 128>}, {pipeline_mode = #tpu.pipeline_mode<synchronous>, transform_indices = @transform_2, window_bounds = array<i64: 1, 128>}, {pipeline_mode = #tpu.pipeline_mode<synchronous>, transform_indices = @transform_3, window_bounds = array<i64: 128, 128>}, {pipeline_mode = #tpu.pipeline_mode<synchronous>, transform_indices = @transform_4, window_bounds = array<i64: 1, 128>}, {transform_indices = @transform_5, window_bounds = array<i64: 8, 128>}]} {
    %c0 = arith.constant 0 : index
    %c0_0 = arith.constant 0 : index
    %0 = vector.load %arg1[%c0, %c0_0] : memref<8x128xf32, #tpu.memory_space<vmem>>, vector<8x128xf32>
    %1 = arith.truncf %0 : vector<8x128xf32> to vector<8x128xbf16>
    %c0_1 = arith.constant 0 : index
    %c0_2 = arith.constant 0 : index
    %2 = vector.load %arg2[%c0_1, %c0_2] : memref<128x128xbf16, #tpu.memory_space<vmem>>, vector<128x128xbf16>
    %cst = arith.constant dense<0.000000e+00> : vector<8x128xf32>
    %3 = tpu.matmul %1, %2, %cst {dimension_numbers = #tpu.dot_dimension_numbers<[1], [0], [0], [1], [0, 0, 1, 1], [], []>} : vector<8x128xbf16>, vector<128x128xbf16>, vector<8x128xf32> -> vector<8x128xf32>
    %c0_3 = arith.constant 0 : index
    %c0_4 = arith.constant 0 : index
    %4 = vector.load %arg3[%c0_3, %c0_4] : memref<1x128xf32, #tpu.memory_space<vmem>>, vector<1x128xf32>
    %5 = vector.broadcast %4 : vector<1x128xf32> to vector<8x128xf32>
    %6 = arith.addf %3, %5 : vector<8x128xf32>
    %cst_5 = arith.constant 5.000000e-01 : f32
    %7 = vector.broadcast %cst_5 : f32 to vector<8x128xf32>
    %8 = arith.mulf %7, %6 : vector<8x128xf32>
    %cst_6 = arith.constant 0.707106769 : f32
    %9 = vector.broadcast %cst_6 : f32 to vector<8x128xf32>
    %10 = arith.mulf %6, %9 : vector<8x128xf32>
    %11 = math.erf %10 : vector<8x128xf32>
    %cst_7 = arith.constant 1.000000e+00 : f32
    %12 = vector.broadcast %cst_7 : f32 to vector<8x128xf32>
    %13 = arith.addf %12, %11 : vector<8x128xf32>
    %14 = arith.mulf %8, %13 : vector<8x128xf32>
    %15 = arith.truncf %14 : vector<8x128xf32> to vector<8x128xbf16>
    %c0_8 = arith.constant 0 : index
    %c0_9 = arith.constant 0 : index
    %16 = vector.load %arg4[%c0_8, %c0_9] : memref<128x128xbf16, #tpu.memory_space<vmem>>, vector<128x128xbf16>
    %cst_10 = arith.constant dense<0.000000e+00> : vector<8x128xf32>
    %17 = tpu.matmul %15, %16, %cst_10 {dimension_numbers = #tpu.dot_dimension_numbers<[1], [0], [0], [1], [0, 0, 1, 1], [], []>} : vector<8x128xbf16>, vector<128x128xbf16>, vector<8x128xf32> -> vector<8x128xf32>
    %c0_11 = arith.constant 0 : index
    %c0_12 = arith.constant 0 : index
    %18 = vector.load %arg5[%c0_11, %c0_12] : memref<1x128xf32, #tpu.memory_space<vmem>>, vector<1x128xf32>
    %19 = vector.broadcast %18 : vector<1x128xf32> to vector<8x128xf32>
    %20 = arith.addf %17, %19 : vector<8x128xf32>
    %c0_13 = arith.constant 0 : index
    %c0_14 = arith.constant 0 : index
    %21 = vector.load %arg1[%c0_13, %c0_14] : memref<8x128xf32, #tpu.memory_space<vmem>>, vector<8x128xf32>
    %22 = arith.addf %20, %21 : vector<8x128xf32>
    %c0_15 = arith.constant 0 : index
    %c0_16 = arith.constant 0 : index
    %23 = vector.load %arg6[%c0_15, %c0_16] : memref<8x128xf32, #tpu.memory_space<vmem>>, vector<8x128xf32>
    tpu.vector_store %arg6[%c0_15, %c0_16], %22 {strides = array<i32>} : memref<8x128xf32, #tpu.memory_space<vmem>>, vector<8x128xf32>,
    return
  }
  func.func @transform_0(%arg0: i32) -> (i32, i32) {
    %c0_i32 = arith.constant 0 : i32
    %c0_i32_0 = arith.constant 0 : i32
    return %arg0, %c0_i32 : i32, i32
  }
  func.func @transform_1(%arg0: i32) -> (i32, i32) {
    %c0_i32 = arith.constant 0 : i32
    %c0_i32_0 = arith.constant 0 : i32
    %c0_i32_1 = arith.constant 0 : i32
    return %c0_i32, %c0_i32_0 : i32, i32
  }
  func.func @transform_2(%arg0: i32) -> (i32, i32) {
    %c0_i32 = arith.constant 0 : i32
    %c0_i32_0 = arith.constant 0 : i32
    %c0_i32_1 = arith.constant 0 : i32
    return %c0_i32, %c0_i32_0 : i32, i32
  }
  func.func @transform_3(%arg0: i32) -> (i32, i32) {
    %c0_i32 = arith.constant 0 : i32
    %c0_i32_0 = arith.constant 0 : i32
    %c0_i32_1 = arith.constant 0 : i32
    return %c0_i32, %c0_i32_0 : i32, i32
  }
  func.func @transform_4(%arg0: i32) -> (i32, i32) {
    %c0_i32 = arith.constant 0 : i32
    %c0_i32_0 = arith.constant 0 : i32
    %c0_i32_1 = arith.constant 0 : i32
    return %c0_i32, %c0_i32_0 : i32, i32
  }
  func.func @transform_5(%arg0: i32) -> (i32, i32) {
    %c0_i32 = arith.constant 0 : i32
    %c0_i32_0 = arith.constant 0 : i32
    return %arg0, %c0_i32 : i32, i32
  }
}

</mosaic_0001>

<bundles_post_ra>
// kernel: resblock_forward.1
= control target key start
LH: loop header
LB: loop body
LE: loop exit
PB: predicated region body
PF: predicated region fallthrough
CT: control target
= control target key end

     0   :  { %10 = vsyncpa [#allocation3], 0  ;;  %s988_s0 = inlined_call_operand.vmem [shape: f32[16,128], index: 0, kind: input, shape index: {}]   ;;  %s989_s1 = inlined_call_operand.vmem [shape: bf16[128,128], index: 1, kind: input, shape index: {}]   ;;  %s990_s2 = inlined_call_operand.vmem [shape: f32[1,128], index: 2, kind: input, shape index: {}]   ;;  %s991_s3 = inlined_call_operand.hbm [shape: bf16[128,128], index: 3, kind: input, shape index: {}]   ;;  %s992_s4 = inlined_call_operand.vmem [shape: f32[1,128], index: 4, kind: input, shape index: {}]   ;;  %s993_s5 = inlined_call_operand.hbm [shape: f32[16,128], index: 5, kind: output, shape index: {}]  }
   0x1   :  { %11 = vsyncpa [#allocation4], 0 }
   0x2   :  { %13 = vsyncpa [#allocation4 + $0x1], 0  ;;  %s841_s18 = smov 0   ;;  %s843_s19 = smov 0  }
   0x3   :  { %s845_s20 = smov 0   ;;  %s847_s21 = smov 0  }
   0x4 LB: > { %s862_s22 = sadd.s32 4294967295, %s803_s21   ;;  %s553_s23 = sadd.s32 4294967294, %s803_s21   ;;  %s803_s21 = sphi %s847_s21, %s1001_s21   ;;  %s799_s20 = sphi %s845_s20, %s1000_s20   ;;  %s795_s19 = sphi %s843_s19, %s999_s19   ;;  %s791_s18 = sphi %s841_s18, %s998_s18  }
   0x5   : > { %s866_s24 = sadd.s32 1, %s803_s21   ;;  %s136_s25 = sadd.s32 1, %s799_s20 }
   0x6   : > { %s133_s26 = ssub.s32 %s803_s21, %s866_s24  ;;  %p146_p0 = scmp.ne.s32.totalorder %s799_s20, %s795_s19 }
   0x7   : > { %p134_p1 = scmp.eq.s32.totalorder %s133_s26, 0  ;;  %p147_p2 = scmp.eq.s32.totalorder %s862_s22, 1 }
   0x8   : > { %p152_p3 = scmp.ne.s32.totalorder %s795_s19, %s791_s18  ;;  %p153_p4 = scmp.eq.s32.totalorder %s553_s23, 1 }
   0x9   : > { %s877_s27 = scalar_select %p134_p1, %s799_s20, %s136_s25  }
   0xa   : > { %p879_p5 = por %p147_p2, %p146_p0  ;;  %p883_p6 = por %p153_p4, %p152_p3 }
   0xb   : > { %p554_p7 = scmp.ge.s32.totalorder %s803_s21, 1  ;;  %p160_p8 = scmp.lt.s32.totalorder %s803_s21, 3 }
   0xc   : > { %s995_s29 = scalar_select %p883_p6, 1, 0 }
   0xd   : > { %p655_p9 = scmp.eq.s32.totalorder %s862_s22, 0  ;;  %p890_p10 = pnand %p554_p7, %p160_p8 }
   0xe   : > { %s805_s6 = smov [#allocation2]  }
   0xf   : > { %s178_s7 = sshll.u32 %s805_s6, 4  ;;  %p647_p11 = pneg %p890_p10  ;;  %s179_s7 = int_to_ptr.vmem [resolvable:$true] %s178_s7 }
  0x10   : > { %s724_s8 = scalar_lea.vmem %s179_s7, 1024  ;;  %p732_p3 = scmp.lt.s32.totalorder %s179_s7, %s179_s7 }
  0x11   : > { %p648_p12 = pnand %p655_p9, %p647_p11  ;;  %p725_p0 = scmp.ne.s32.totalorder %s179_s7, %s724_s8 }
  0x12   : > { %p733_p4 = scmp.lt.s32.totalorder %s724_s8, %s724_s8 }
  0x13   : > { %p715_p13 = pneg %p648_p12 }
  0x14   : > { %p734_p6 = por %p733_p4, %p732_p3 }
  0x15   : > { %p727_p1 = pnand %p725_p0, %p715_p13 }
  0x17   : > { %p728_p2 = pneg %p727_p1 }
  0x19   : > { %p735_p7 = pnand %p734_p6, %p728_p2 }
  0x1b   : > { %738 = shalt.err (!%p735_p7)
}
  0x1c   : > { %s806_s9 = smov 64   ;;  %s807_s10 = smov 4  }
  0x1d   : > { %650 = dma.hbm_to_vmem [thread:$0]  (!%p648_p12), %s991_s3, 1024, %s179_s7, [#allocation3], %s806_s9, %s806_s9, %s807_s10  }
  0x1e   : > { %204 = sbr.rel (%p890_p10) target bundleno = 498 (0x1f2), region = 40 }
  0x23   : > { %782 = dma.done.wait (%p655_p9), [#allocation3], 1024  }
  0x24   : > { %784 = vsyncadd (%p655_p9), [#allocation3], 4294966272  ;;  %v808_v0 = vmov 0.0   ;;  %vm809_vm0 = vmmov 0   ;;  %v695_v1 = vld [vmem:[%s989_s1 + $0x38] sm:$0xff]   ;;  %v696_v2 = vld [vmem:[%s989_s1 + $0x30] sm:$0xff]  }
  0x25   : > { %601 = vmatprep.subr.bf16.mxu0 %v808_v0  ;;  %617 = vmatprep.mubr.msk.bf16.mxu0 %vm809_vm0, %v808_v0  ;;  %v697_v3 = vld [vmem:[%s989_s1 + $0x28] sm:$0xff]   ;;  %v703_v4 = vld [vmem:[#allocation2 + $0x38] sm:$0xff]   ;;  %v698_v5 = vld [vmem:[%s989_s1 + $0x20] sm:$0xff]   ;;  %p231_p6 = scmp.lt.s32.totalorder %s862_s22, 1  ;;  %s228_s26 = sand.u32 1, %s795_s19  }
  0x26   : > { %621 = vmatprep.subr.bf16.mxu1 %v808_v0  ;;  %637 = vmatprep.mubr.msk.bf16.mxu1 %vm809_vm0, %v808_v0  ;;  %v704_v6 = vld [vmem:[#allocation2 + $0x30] sm:$0xff]   ;;  %v699_v7 = vld [vmem:[%s989_s1 + $0x18] sm:$0xff]   ;;  %v701_v9 = vld [vmem:[%s989_s1 + $0x8] sm:$0xff]   ;;  %s559_s30 = sshll.u32 %s228_s26, 3  ;;  %s580_s8 = sshll.u32 %s862_s22, 7 }
  0x27   : > { %602 = vmatpush3.bf16.msra.mxu0 %v695_v1  ;;  %622 = vmatpush3.bf16.msra.mxu1 %v703_v4  ;;  %s232_s7 = scalar_select %p231_p6, %s862_s22, 1  ;;  %v700_v8 = vld [vmem:[%s989_s1 + $0x10] sm:$0xff]   ;;  %v702_v10 = vld [vmem:[%s989_s1] sm:$0xff]   ;;  %v705_v13 = vld [vmem:[#allocation2 + $0x28] sm:$0xff]  }
  0x28   : > { %603 = vmatprep.subr.bf16.mxu0 %v808_v0  ;;  %623 = vmatprep.subr.bf16.mxu1 %v808_v0  ;;  %v706_v14 = vld [vmem:[#allocation2 + $0x20] sm:$0xff]   ;;  %v707_v15 = vld [vmem:[#allocation2 + $0x18] sm:$0xff]   ;;  %v708_v16 = vld [vmem:[#allocation2 + $0x10] sm:$0xff]   ;;  %s230_s9 = scalar_lea.vmem [#allocation5], %s559_s30  ;;  %s947_s13 = scalar_lea.hbm %s993_s5, %s580_s8 }
  0x29   : > { %s560_s10 = sshll.u32 %s232_s7, 3  ;;  %v709_v17 = vld [vmem:[#allocation2 + $0x8] sm:$0xff]   ;;  %v710_v18 = vld [vmem:[#allocation2] sm:$0xff]   ;;  %s469_s14 = scalar_lea.sflag [#allocation4], %s228_s26 }
  0x2a   : > { %s234_s15 = scalar_lea.vmem %s988_s0, %s560_s10  ;;  %v561_v19 = vld [vmem:[%s990_s2] ss:$0 sm:$0xff]  ;;  %s482_s10 = sshll.u32 %s230_s9, 4  ;;  %s949_s10 = int_to_ptr.vmem [resolvable:$true] %s482_s10 }
  0x2b   : > { %604 = vmatpush3.bf16.msra.mxu0 %v696_v2  ;;  %624 = vmatpush3.bf16.msra.mxu1 %v704_v6  ;;  %v236_v11 = vld [vmem:[%s234_s15] sm:$0xff]  ;;  %s739_s22 = scalar_lea.vmem %s949_s10, 128  ;;  %s810_s15 = smov [#allocation5]  }
  0x2c   : > { %605 = vmatprep.subr.bf16.mxu0 %v808_v0  ;;  %625 = vmatprep.subr.bf16.mxu1 %v808_v0  ;;  %v237_v12 = vpack.c.bf16 %v236_v11, %v236_v11  ;;  %v570_v31 = vld [vmem:[%s992_s4] ss:$0 sm:$0xff]  ;;  %p740_p8 = scmp.ne.s32.totalorder %s949_s10, %s739_s22  ;;  %s743_s16 = sshll.u32 %s810_s15, 4  ;;  %s744_s16 = int_to_ptr.vmem [resolvable:$false] %s743_s16 }
  0x2d   : > { %s745_s17 = scalar_lea.vmem %s744_s16, 256  ;;  %p746_p11 = scmp.lt.s32.totalorder %s949_s10, %s744_s16 }
  0x2e   : > { %p741_p9 = pnand %p740_p8, %p879_p5  ;;  %p747_p12 = scmp.lt.s32.totalorder %s745_s17, %s739_s22 }
  0x2f   : > { %606 = vmatpush3.bf16.msra.mxu0 %v697_v3  ;;  %626 = vmatpush3.bf16.msra.mxu1 %v705_v13 }
  0x30   : > { %607 = vmatprep.subr.bf16.mxu0 %v808_v0  ;;  %627 = vmatprep.subr.bf16.mxu1 %v808_v0  ;;  %p742_p10 = pneg %p741_p9  ;;  %p748_p13 = por %p747_p12, %p746_p11 }
  0x32   : > { %p749_p0 = pnand %p748_p13, %p742_p10 }
  0x33   : > { %608 = vmatpush3.bf16.msra.mxu0 %v698_v5  ;;  %628 = vmatpush3.bf16.msra.mxu1 %v706_v14 }
  0x34   : > { %609 = vmatprep.subr.bf16.mxu0 %v808_v0  ;;  %629 = vmatprep.subr.bf16.mxu1 %v808_v0 }
  0x37   : > { %610 = vmatpush3.bf16.msra.mxu0 %v699_v7  ;;  %630 = vmatpush3.bf16.msra.mxu1 %v707_v15 }
  0x38   : > { %611 = vmatprep.subr.bf16.mxu0 %v808_v0  ;;  %631 = vmatprep.subr.bf16.mxu1 %v808_v0 }
  0x3b   : > { %612 = vmatpush3.bf16.msra.mxu0 %v700_v8  ;;  %632 = vmatpush3.bf16.msra.mxu1 %v708_v16 }
  0x3c   : > { %613 = vmatprep.subr.bf16.mxu0 %v808_v0  ;;  %633 = vmatprep.subr.bf16.mxu1 %v808_v0 }
  0x3f   : > { %614 = vmatpush3.bf16.msra.mxu0 %v701_v9  ;;  %634 = vmatpush3.bf16.msra.mxu1 %v709_v17 }
  0x40   : > { %615 = vmatprep.subr.bf16.mxu0 %v808_v0  ;;  %635 = vmatprep.subr.bf16.mxu1 %v808_v0 }
  0x43   : > { %616 = vmatpush3.bf16.msra.mxu0 %v702_v10  ;;  %636 = vmatpush3.bf16.msra.mxu1 %v710_v18 }
  0x46   : > { %618 = vmatmul.mubr.bf16.vlgmr.msra.gmra.mxu0 %v237_v12 }
 0x106   : > { %v343_v20 = vpop.f32.mrf.mxu0 }
 0x107   : > { %v344_v21 = vadd.f32 %v561_v19, %v343_v20 }
 0x108   : > { %v619_v22 = vpop.f32.mrf.mxu0 }
 0x109   : > { %v350_v23 = vmul.f32 0.70710677, %v344_v21  ;;  %v349_v27 = vmul.f32 0.5, %v344_v21 }
 0x10a   : > { %v346_v24 = vpop.f32.mrf.mxu0 }
 0x10b   : > { %711 = verf.f32 %v350_v23 }
 0x10c   : > { %v620_v25 = vpop.f32.mrf.mxu0 }
 0x118   : > { %v712_v26 = vpop.eup %711 }
 0x119   : > { %v352_v28 = vadd.f32 1.0, %v712_v26 }
 0x11b   : > { %v353_v29 = vmul.f32 %v352_v28, %v349_v27 }
 0x11d   : > { %v354_v30 = vpack.c.bf16 %v353_v29, %v353_v29 }
 0x11f   : > { %638 = vmatmul.mubr.bf16.vlgmr.msra.gmra.mxu1 %v354_v30 }
 0x1df   : > { %v460_v32 = vpop.f32.mrf.mxu1 }
 0x1e0   : > { %v461_v33 = vadd.f32 %v570_v31, %v460_v32 }
 0x1e1   : > { %v639_v34 = vpop.f32.mrf.mxu1 }
 0x1e2   : > { %v466_v35 = vadd.f32 %v461_v33, %v236_v11 }
 0x1e3   : > { %v463_v36 = vpop.f32.mrf.mxu1 }
 0x1e4   : > { %467 = vst [vmem:[%s230_s9] sm:$0xff] %v466_v35 }
 0x1e5   : > { %v640_v37 = vpop.f32.mrf.mxu1 }
 0x1e6   : > { %752 = shalt.err (!%p749_p0)
}
 0x1e7   : > { %s753_s23 = scalar_lea.hbm %s947_s13, 128  ;;  %s757_s30 = scalar_lea.hbm %s993_s5, 256 }
 0x1e8   : > { %p754_p1 = scmp.ne.s32.totalorder %s947_s13, %s753_s23  ;;  %p758_p4 = scmp.lt.s32.totalorder %s947_s13, %s993_s5 }
 0x1e9   : > { %p759_p7 = scmp.lt.s32.totalorder %s757_s30, %s753_s23 }
 0x1ea   : > { %p755_p2 = pnand %p754_p1, %p879_p5 }
 0x1eb   : > { %p760_p6 = por %p759_p7, %p758_p4 }
 0x1ec   : > { %p756_p3 = pneg %p755_p2 }
 0x1ee   : > { %p761_p8 = pnand %p760_p6, %p756_p3 }
 0x1f0   : > { %764 = shalt.err (!%p761_p8)
}
 0x1f1   : > { %645 = dma.vmem_to_hbm [thread:$0]  (%p879_p5), %s949_s10, 128, %s947_s13, %s469_s14  }
 0x1f2 PF: > { %p657_p9 = scmp.ge.s32.totalorder %s803_s21, 2  ;;  %s494_s8 = sand.u32 1, %s791_s18  }
 0x1f3   : > { %p997_p10 = scmp.ne.s32.totalorder %s995_s29, 0  ;;  %s495_s9 = scalar_lea.sflag [#allocation4], %s494_s8 }
 0x1f5   : > { %p652_p11 = pnand %p657_p9, %p997_p10 }
 0x1f7   : > { %p653_p12 = pneg %p652_p11 }
 0x1f9   : > { %786 = dma.done.wait (%p653_p12), %s495_s9, 128  }
 0x1fa   : > { %788 = vsyncadd (%p653_p12), %s495_s9, 4294967168  ;;  %p16_p13 = scmp.ge.s32.totalorder %s866_s24, 4   ;;  %s998_s18 = smov %s795_s19 }
 0x1fb   : > { %s999_s19 = smov %s799_s20  ;;  %s1000_s20 = smov %s877_s27 }
 0x1fc   : > { %s1001_s21 = smov %s866_s24  ;;  %18 = sbr.rel (!%p16_p13) target bundleno = 4 (0x4), region = 80 }
 0x201   :  { %500 = vsyncpa [#allocation3], 1 }
 0x202   :  { %502 = vsyncpa [#allocation3 + $0x1], 1 }
 0x203   :  { %503 = vsyncpa [#allocation4], 1 }
 0x204   :  { %505 = vsyncpa [#allocation4 + $0x1], 1 }

</bundles_post_ra>
